<compile_context>
chip_gen: v6e
topology: v6e:2x2x1
jax: 0.10.0
libtpu: 0.0.40
codegen_flags: <defaults>
</compile_context>

<pallas_src>
import functools

import jax
import jax.numpy as jnp
from jax.experimental import pallas as pl
from jax.experimental.pallas import tpu as pltpu


# ----------------------------- kernels ------------------------------------ #

def _layer_norm(x, gamma, beta, eps=1e-5):
    mu = jnp.mean(x, axis=-1, keepdims=True)
    var = jnp.mean((x - mu) ** 2, axis=-1, keepdims=True)
    return (x - mu) * jax.lax.rsqrt(var + eps) * gamma + beta


def qkv_kernel(x_ref, wqkv_ref, bqkv_ref, qkv_ref):
    # x_ref: (S, E) f32; wqkv_ref: (E, 3E) bf16 (Wq pre-scaled by 1/sqrt(dk));
    # bqkv_ref: (1, 3E) f32; qkv_ref: (S, 3E) bf16.
    x = x_ref[...].astype(jnp.bfloat16)
    h = jnp.dot(x, wqkv_ref[...], preferred_element_type=jnp.float32) + bqkv_ref[...]
    qkv_ref[...] = h.astype(jnp.bfloat16)


def attn_ffn_kernel(x_ref, q_ref, kT_ref, v_ref, bias_ref,
                    wo_ref, bo_ref, g1_ref, be1_ref,
                    w1_ref, b1_ref, w2_ref, b2_ref,
                    g2_ref, be2_ref, o_ref, *, att_heads, d_k, merge_concat):
    H, dk = att_heads, d_k
    f32, bf16 = jnp.float32, jnp.bfloat16

    q = q_ref[...]      # (H, S, dk) bf16, already scaled by 1/sqrt(dk) via Wq
    kT = kT_ref[...]    # (H, dk, S) bf16 (lane-dense S minor dim)
    v = v_ref[...]      # (H, S, dk) bf16

    # --- all-head scaled dot-product attention (batched over heads) ---
    scores = jnp.einsum("hqd,hdk->hqk", q, kT, preferred_element_type=f32)   # (H, S, S)
    scores = scores + bias_ref[...][None]            # (1,1,S) additive padding-mask bias
    m = jnp.max(scores, axis=-1, keepdims=True)
    e = jnp.exp(scores - m)
    denom = jnp.sum(e, axis=-1, keepdims=True)
    attn = (e * pl.reciprocal(denom, approx=True)).astype(bf16)
    ctx = jnp.einsum("hqk,hkd->hqd", attn, v, preferred_element_type=f32)    # (H, S, dk)

    # --- output projection ---
    if merge_concat:
        # Head-merge (== PyTorch transpose(1,2).contiguous().view) materialized by a
        # lane concat, then ONE K=E matmul against the full Wo^T (wo_ref: (E, E)).
        merged = jnp.concatenate([ctx[h] for h in range(H)], axis=-1).astype(bf16)  # (S, E)
        out_att = jnp.dot(merged, wo_ref[...], preferred_element_type=f32) + bo_ref[...]
    else:
        # Fallback path (previously validated): per-head row-block matmuls,
        # wo_ref: (H, dk, E).
        out_att = jnp.dot(ctx[0].astype(bf16), wo_ref[0],
                          preferred_element_type=f32) + bo_ref[...]
        for h in range(1, H):
            out_att = out_att + jnp.dot(ctx[h].astype(bf16), wo_ref[h],
                                        preferred_element_type=f32)

    # --- Add & Norm 1, FFN, Add & Norm 2 (f32 residual / LN math) ---
    x = x_ref[...]
    a1 = _layer_norm(x + out_att, g1_ref[...], be1_ref[...])
    hid = jnp.dot(a1.astype(bf16), w1_ref[...], preferred_element_type=f32) + b1_ref[...]
    hid = jnp.maximum(hid, 0.0)                      # ReLU
    ff = jnp.dot(hid.astype(bf16), w2_ref[...], preferred_element_type=f32) + b2_ref[...]
    o_ref[...] = _layer_norm(a1 + ff, g2_ref[...], be2_ref[...])


# ----------------------------- wrapper ------------------------------------ #

# Raised scoped-VMEM limit (safe on v5e/v6e/v7x; tune per generation at real sizes).
_VMEM_LIMIT_BYTES = 64 * 1024 * 1024


def my_bert_layer(x, mask, params, *, att_heads, optimized=True):
    """x: (B, S, E) f32, mask: (B, S) f32 (nonzero = keep)."""
    B, S, E = x.shape
    H = att_heads
    dk = E // H
    F = params["w1_t"].shape[1]
    bf16 = jnp.bfloat16
    inv_sqrt_dk = 1.0 / (float(dk) ** 0.5)

    # Fold the 1/sqrt(dk) attention scale into Wq/bq (free), fuse Q/K/V weights into one
    # (E, 3E) matrix, cast matmul weights to bf16 once here.
    wq = params["wq_t"] * inv_sqrt_dk
    bq = params["bq"] * inv_sqrt_dk
    wqkv = jnp.concatenate([wq, params["wk_t"], params["wv_t"]], axis=1).astype(bf16)
    bqkv = jnp.concatenate([bq, params["bk"], params["bv"]], axis=1)  # stays f32

    wo = params["wo_t"].astype(bf16)   # (E, E)
    w1 = params["w1_t"].astype(bf16)   # (E, F)
    w2 = params["w2_t"].astype(bf16)   # (F, E)

    def const(shape):
        # Grid-invariant operand: single-buffer it when the Pallas build supports it.
        idx = lambda b, _n=len(shape): (0,) * _n
        if optimized:
            return pl.BlockSpec(shape, idx, pipeline_mode=pl.Buffered(1))
        return pl.BlockSpec(shape, idx)

    cparams = pltpu.CompilerParams(
        dimension_semantics=("parallel",),
        vmem_limit_bytes=_VMEM_LIMIT_BYTES,
    )

    # --- kernel 1: fused Q|K|V projection, one (S,E)x(E,3E) matmul per batch row ---
    qkv = pl.pallas_call(
        qkv_kernel,
        grid=(B,),
        in_specs=[
            pl.BlockSpec((None, S, E), lambda b: (b, 0, 0)),
            const((E, 3 * E)),
            const((1, 3 * E)),
        ],
        out_specs=pl.BlockSpec((None, S, 3 * E), lambda b: (b, 0, 0)),
        out_shape=jax.ShapeDtypeStruct((B, S, 3 * E), bf16),   # bf16 HBM round trip
        compiler_params=cparams,
    )(x, wqkv, bqkv)

    # Exact PyTorch `.view(B, H, -1, d_k)` semantics: contiguous C-order reshape of each
    # (S, E) block. K is additionally transposed so its lane (minor) dim is S.
    q4 = qkv[:, :, 0 * E:1 * E].reshape(B, H, S, dk)
    k4 = qkv[:, :, 1 * E:2 * E].reshape(B, H, S, dk)
    v4 = qkv[:, :, 2 * E:3 * E].reshape(B, H, S, dk)
    kT = jnp.swapaxes(k4, 2, 3)                                  # (B, H, dk, S)

    # Additive mask bias, computed once (masked_fill(-1e9) and add(-1e9) give identical
    # probabilities after softmax since exp underflows to exactly 0).
    bias = jnp.where(mask == 0.0, -1.0e9, 0.0).astype(jnp.float32).reshape(B, 1, S)

    if optimized:
        wo_arg, wo_spec = wo, const((E, E))
    else:
        wo_arg, wo_spec = wo.reshape(H, dk, E), const((H, dk, E))

    # --- kernel 2 (fused): attention + out-proj + add&norm1 + FFN + add&norm2 ---
    out = pl.pallas_call(
        functools.partial(attn_ffn_kernel, att_heads=H, d_k=dk, merge_concat=optimized),
        grid=(B,),
        in_specs=[
            pl.BlockSpec((None, S, E), lambda b: (b, 0, 0)),          # x (f32 residual)
            pl.BlockSpec((None, H, S, dk), lambda b: (b, 0, 0, 0)),   # q (bf16)
            pl.BlockSpec((None, H, dk, S), lambda b: (b, 0, 0, 0)),   # k^T (bf16)
            pl.BlockSpec((None, H, S, dk), lambda b: (b, 0, 0, 0)),   # v (bf16)
            pl.BlockSpec((None, 1, S), lambda b: (b, 0, 0)),          # mask bias
            wo_spec, const((1, E)),                                   # Wo^T, bo
            const((1, E)), const((1, E)),                             # ln1 gamma, beta
            const((E, F)), const((1, F)),                             # w1, b1
            const((F, E)), const((1, E)),                             # w2, b2
            const((1, E)), const((1, E)),                             # ln2 gamma, beta
        ],
        out_specs=pl.BlockSpec((None, S, E), lambda b: (b, 0, 0)),
        out_shape=jax.ShapeDtypeStruct((B, S, E), jnp.float32),
        compiler_params=cparams,
    )(x, q4, kT, v4, bias,
      wo_arg, params["bo"], params["ln1_g"], params["ln1_b"],
      w1, params["b1"], w2, params["b2"],
      params["ln2_g"], params["ln2_b"])

    return out


# ----------------------------- reference (plain JAX, f32) ------------------ #

def reference(x, mask, params, *, att_heads):
    B, S, E = x.shape
    H = att_heads
    dk = E // H
    q = x @ params["wq_t"] + params["bq"]
    k = x @ params["wk_t"] + params["bk"]
    v = x @ params["wv_t"] + params["bv"]
    q4 = q.reshape(B, H, S, dk)
    k4 = k.reshape(B, H, S, dk)
    v4 = v.reshape(B, H, S, dk)
    scores = jnp.einsum("bhqd,bhkd->bhqk", q4, k4) * (1.0 / (float(dk) ** 0.5))
    scores = jnp.where(mask[:, None, None, :] == 0.0, -1.0e9, scores)
    scores = scores - jnp.max(scores, axis=-1, keepdims=True)
    e = jnp.exp(scores)
    attn = e / jnp.sum(e, axis=-1, keepdims=True)
    ctx4 = jnp.einsum("bhqk,bhkd->bhqd", attn, v4)
    ctx = jnp.transpose(ctx4, (0, 2, 1, 3)).reshape(B, S, E)
    out_att = ctx @ params["wo_t"] + params["bo"]
    a1 = _layer_norm(x + out_att, params["ln1_g"], params["ln1_b"])
    h = jnp.maximum(a1 @ params["w1_t"] + params["b1"], 0.0)
    ff = h @ params["w2_t"] + params["b2"]
    return _layer_norm(a1 + ff, params["ln2_g"], params["ln2_b"])


# ----------------------------- setup & run --------------------------------- #

def make_params(key, embed_dim, d_ff):
    E, F = embed_dim, d_ff
    ks = jax.random.split(key, 12)
    n = lambda k, shp: (0.05 * jax.random.normal(k, shp, jnp.float32))
    # PyTorch nn.Linear stores W as (out, in); we pass W^T = (in, out) to the kernels.
    return {
        "wq_t": n(ks[0], (E, E)).T, "bq": n(ks[1], (1, E)),
        "wk_t": n(ks[2], (E, E)).T, "bk": n(ks[3], (1, E)),
        "wv_t": n(ks[4], (E, E)).T, "bv": n(ks[5], (1, E)),
        "wo_t": n(ks[6], (E, E)).T, "bo": n(ks[7], (1, E)),
        "w1_t": n(ks[8], (F, E)).T, "b1": n(ks[9], (1, F)),
        "w2_t": n(ks[10], (E, F)).T, "b2": n(ks[11], (1, E)),
        # nn.LayerNorm default init: weight=1, bias=0
        "ln1_g": jnp.ones((1, E), jnp.float32), "ln1_b": jnp.zeros((1, E), jnp.float32),
        "ln2_g": jnp.ones((1, E), jnp.float32), "ln2_b": jnp.zeros((1, E), jnp.float32),
    }


if __name__ == "__main__":
    B, S, E, H, F = 2, 8, 32, 4, 64   # batch, seq, embed_dim, att_heads, d_ff (validation-only)

    key = jax.random.PRNGKey(0)
    kx, kp = jax.random.split(key)
    x = jax.random.normal(kx, (B, S, E), jnp.float32)
    # padding mask: first sequence fully valid, second has 3 padded positions
    lengths = jnp.array([8, 5], jnp.int32)
    mask = (jnp.arange(S)[None, :] < lengths[:, None]).astype(jnp.float32)  # (B, S)

    params = make_params(kp, E, F)

    try:
        out = my_bert_layer(x, mask, params, att_heads=H, optimized=True)
        out = jax.block_until_ready(out)
    except Exception:
        # Fallback for Pallas/Mosaic builds without pl.Buffered(1) single-buffering or
        # unaligned lane-concat support: previously-validated per-head projection path.
        out = my_bert_layer(x, mask, params, att_heads=H, optimized=False)
        out = jax.block_until_ready(out)

    ref = reference(x, mask, params, att_heads=H)
    assert out.shape == (B, S, E)
    # bf16 matmul operands + approx reciprocal => loosened tolerance vs f32 reference.
    assert jnp.max(jnp.abs(out - ref)) < 5e-2, "mismatch vs plain-JAX reference"

    print("KERNEL_OK")
</pallas_src>

<mosaic_0001>
module attributes {stable_mosaic.version = 11 : i64} {
  func.func @qkv_kernel(%arg0: i32, %arg1: memref<1x8x32xf32, #tpu.memory_space<vmem>>, %arg2: memref<32x96xbf16, #tpu.memory_space<vmem>>, %arg3: memref<1x96xf32, #tpu.memory_space<vmem>>, %arg4: memref<1x8x96xbf16, #tpu.memory_space<vmem>>) attributes {dimension_semantics = [#tpu.dimension_semantics<parallel>], iteration_bounds = array<i64: 2>, scalar_prefetch = 0 : i64, scratch_operands = 0 : i64, tpu.core_type = #tpu.core_type<tc>, window_params = [{transform_indices = @transform_0, window_bounds = array<i64: 1, 8, 32>}, {pipeline_mode = #tpu.pipeline_mode<synchronous>, transform_indices = @transform_1, window_bounds = array<i64: 32, 96>}, {pipeline_mode = #tpu.pipeline_mode<synchronous>, transform_indices = @transform_2, window_bounds = array<i64: 1, 96>}, {transform_indices = @transform_3, window_bounds = array<i64: 1, 8, 96>}]} {
    %c0 = arith.constant 0 : index
    %c0_0 = arith.constant 0 : index
    %c0_1 = arith.constant 0 : index
    %0 = vector.load %arg1[%c0, %c0_0, %c0_1] : memref<1x8x32xf32, #tpu.memory_space<vmem>>, vector<1x8x32xf32>
    %1 = vector.shape_cast %0 : vector<1x8x32xf32> to vector<8x32xf32>
    %2 = arith.truncf %1 : vector<8x32xf32> to vector<8x32xbf16>
    %c0_2 = arith.constant 0 : index
    %c0_3 = arith.constant 0 : index
    %3 = vector.load %arg2[%c0_2, %c0_3] : memref<32x96xbf16, #tpu.memory_space<vmem>>, vector<32x96xbf16>
    %cst = arith.constant dense<0.000000e+00> : vector<8x96xf32>
    %4 = tpu.matmul %2, %3, %cst {dimension_numbers = #tpu.dot_dimension_numbers<[1], [0], [0], [1], [0, 0, 1, 1], [], []>} : vector<8x32xbf16>, vector<32x96xbf16>, vector<8x96xf32> -> vector<8x96xf32>
    %c0_4 = arith.constant 0 : index
    %c0_5 = arith.constant 0 : index
    %5 = vector.load %arg3[%c0_4, %c0_5] : memref<1x96xf32, #tpu.memory_space<vmem>>, vector<1x96xf32>
    %6 = vector.broadcast %5 : vector<1x96xf32> to vector<8x96xf32>
    %7 = arith.addf %4, %6 : vector<8x96xf32>
    %8 = arith.truncf %7 : vector<8x96xf32> to vector<8x96xbf16>
    %c0_6 = arith.constant 0 : index
    %c0_7 = arith.constant 0 : index
    %c0_8 = arith.constant 0 : index
    %9 = vector.load %arg4[%c0_6, %c0_7, %c0_8] : memref<1x8x96xbf16, #tpu.memory_space<vmem>>, vector<1x8x96xbf16>
    %10 = vector.shape_cast %9 : vector<1x8x96xbf16> to vector<8x96xbf16>
    %11 = vector.shape_cast %8 : vector<8x96xbf16> to vector<1x8x96xbf16>
    tpu.vector_store %arg4[%c0_6, %c0_7, %c0_8], %11 {strides = array<i32>} : memref<1x8x96xbf16, #tpu.memory_space<vmem>>, vector<1x8x96xbf16>,
    return
  }
  func.func @transform_0(%arg0: i32) -> (i32, i32, i32) {
    %c0_i32 = arith.constant 0 : i32
    %c0_i32_0 = arith.constant 0 : i32
    %c0_i32_1 = arith.constant 0 : i32
    return %arg0, %c0_i32, %c0_i32_0 : i32, i32, i32
  }
  func.func @transform_1(%arg0: i32) -> (i32, i32) {
    %c0_i32 = arith.constant 0 : i32
    %c0_i32_0 = arith.constant 0 : i32
    %c0_i32_1 = arith.constant 0 : i32
    return %c0_i32, %c0_i32_0 : i32, i32
  }
  func.func @transform_2(%arg0: i32) -> (i32, i32) {
    %c0_i32 = arith.constant 0 : i32
    %c0_i32_0 = arith.constant 0 : i32
    %c0_i32_1 = arith.constant 0 : i32
    return %c0_i32, %c0_i32_0 : i32, i32
  }
  func.func @transform_3(%arg0: i32) -> (i32, i32, i32) {
    %c0_i32 = arith.constant 0 : i32
    %c0_i32_0 = arith.constant 0 : i32
    %c0_i32_1 = arith.constant 0 : i32
    return %arg0, %c0_i32, %c0_i32_0 : i32, i32, i32
  }
}

module attributes {stable_mosaic.version = 11 : i64} {
  func.func @qkv_kernel(%arg0: i32, %arg1: memref<1x8x32xf32, #tpu.memory_space<vmem>>, %arg2: memref<32x96xbf16, #tpu.memory_space<vmem>>, %arg3: memref<1x96xf32, #tpu.memory_space<vmem>>, %arg4: memref<1x8x96xbf16, #tpu.memory_space<vmem>>) attributes {dimension_semantics = [#tpu.dimension_semantics<parallel>], iteration_bounds = array<i64: 2>, scalar_prefetch = 0 : i64, scratch_operands = 0 : i64, tpu.core_type = #tpu.core_type<tc>, window_params = [{transform_indices = @transform_0, window_bounds = array<i64: 1, 8, 32>}, {pipeline_mode = #tpu.pipeline_mode<synchronous>, transform_indices = @transform_1, window_bounds = array<i64: 32, 96>}, {pipeline_mode = #tpu.pipeline_mode<synchronous>, transform_indices = @transform_2, window_bounds = array<i64: 1, 96>}, {transform_indices = @transform_3, window_bounds = array<i64: 1, 8, 96>}]} {
    %c0 = arith.constant 0 : index
    %c0_0 = arith.constant 0 : index
    %c0_1 = arith.constant 0 : index
    %0 = vector.load %arg1[%c0, %c0_0, %c0_1] : memref<1x8x32xf32, #tpu.memory_space<vmem>>, vector<1x8x32xf32>
    %1 = vector.shape_cast %0 : vector<1x8x32xf32> to vector<8x32xf32>
    %2 = arith.truncf %1 : vector<8x32xf32> to vector<8x32xbf16>
    %c0_2 = arith.constant 0 : index
    %c0_3 = arith.constant 0 : index
    %3 = vector.load %arg2[%c0_2, %c0_3] : memref<32x96xbf16, #tpu.memory_space<vmem>>, vector<32x96xbf16>
    %cst = arith.constant dense<0.000000e+00> : vector<8x96xf32>
    %4 = tpu.matmul %2, %3, %cst {dimension_numbers = #tpu.dot_dimension_numbers<[1], [0], [0], [1], [0, 0, 1, 1], [], []>} : vector<8x32xbf16>, vector<32x96xbf16>, vector<8x96xf32> -> vector<8x96xf32>
    %c0_4 = arith.constant 0 : index
    %c0_5 = arith.constant 0 : index
    %5 = vector.load %arg3[%c0_4, %c0_5] : memref<1x96xf32, #tpu.memory_space<vmem>>, vector<1x96xf32>
    %6 = vector.broadcast %5 : vector<1x96xf32> to vector<8x96xf32>
    %7 = arith.addf %4, %6 : vector<8x96xf32>
    %8 = arith.truncf %7 : vector<8x96xf32> to vector<8x96xbf16>
    %c0_6 = arith.constant 0 : index
    %c0_7 = arith.constant 0 : index
    %c0_8 = arith.constant 0 : index
    %9 = vector.load %arg4[%c0_6, %c0_7, %c0_8] : memref<1x8x96xbf16, #tpu.memory_space<vmem>>, vector<1x8x96xbf16>
    %10 = vector.shape_cast %9 : vector<1x8x96xbf16> to vector<8x96xbf16>
    %11 = vector.shape_cast %8 : vector<8x96xbf16> to vector<1x8x96xbf16>
    tpu.vector_store %arg4[%c0_6, %c0_7, %c0_8], %11 {strides = array<i32>} : memref<1x8x96xbf16, #tpu.memory_space<vmem>>, vector<1x8x96xbf16>,
    return
  }
  func.func @transform_0(%arg0: i32) -> (i32, i32, i32) {
    %c0_i32 = arith.constant 0 : i32
    %c0_i32_0 = arith.constant 0 : i32
    %c0_i32_1 = arith.constant 0 : i32
    return %arg0, %c0_i32, %c0_i32_0 : i32, i32, i32
  }
  func.func @transform_1(%arg0: i32) -> (i32, i32) {
    %c0_i32 = arith.constant 0 : i32
    %c0_i32_0 = arith.constant 0 : i32
    %c0_i32_1 = arith.constant 0 : i32
    return %c0_i32, %c0_i32_0 : i32, i32
  }
  func.func @transform_2(%arg0: i32) -> (i32, i32) {
    %c0_i32 = arith.constant 0 : i32
    %c0_i32_0 = arith.constant 0 : i32
    %c0_i32_1 = arith.constant 0 : i32
    return %c0_i32, %c0_i32_0 : i32, i32
  }
  func.func @transform_3(%arg0: i32) -> (i32, i32, i32) {
    %c0_i32 = arith.constant 0 : i32
    %c0_i32_0 = arith.constant 0 : i32
    %c0_i32_1 = arith.constant 0 : i32
    return %arg0, %c0_i32, %c0_i32_0 : i32, i32, i32
  }
}

</mosaic_0001>

<bundles_post_ra>
// kernel: tpu_custom_call.1
= control target key start
LH: loop header
LB: loop body
LE: loop exit
PB: predicated region body
PF: predicated region fallthrough
CT: control target
= control target key end

     0   :  { %8 = vsyncpa [#allocation3], 0  ;;  %s781_s0 = inlined_call_operand.hbm [shape: f32[2,8,32], index: 0, kind: input, shape index: {}]   ;;  %s782_s1 = inlined_call_operand.hbm [shape: bf16[32,96], index: 1, kind: input, shape index: {}]   ;;  %s783_s2 = inlined_call_operand.vmem [shape: f32[1,96], index: 2, kind: input, shape index: {}]   ;;  %s784_s3 = inlined_call_operand.hbm [shape: bf16[2,8,96], index: 3, kind: output, shape index: {}]  }
   0x1   :  { %10 = vsyncpa [#allocation3 + $0x1], 0 }
   0x2   :  { %11 = vsyncpa [#allocation6], 0 }
   0x3   :  { %12 = vsyncpa [#allocation4], 0 }
   0x4   :  { %14 = vsyncpa [#allocation4 + $0x1], 0  ;;  %s611_s12 = smov 0   ;;  %s613_s13 = smov 0  }
   0x5   :  { %s615_s14 = smov 0   ;;  %s617_s15 = smov 0  }
   0x6 LB: > { %s632_s16 = sadd.s32 4294967295, %s582_s15   ;;  %s368_s17 = sadd.s32 4294967294, %s582_s15   ;;  %s582_s15 = sphi %s617_s15, %s806_s15   ;;  %s578_s14 = sphi %s615_s14, %s805_s14   ;;  %s574_s13 = sphi %s613_s13, %s804_s13   ;;  %s570_s12 = sphi %s611_s12, %s803_s12  }
   0x7   : > { %p40_p0 = scmp.ne.s32.totalorder %s574_s13, %s570_s12  ;;  %p785_p1 = scmp.eq.s32.totalorder %s632_s16, 0 }
   0x8   : > { %p112_p3 = scmp.eq.s32.totalorder %s368_s17, 1  ;;  %p369_p5 = scmp.ge.s32.totalorder %s582_s15, 1 }
   0x9   : > { %p641_p4 = por %p785_p1, %p40_p0  ;;  %p119_p7 = scmp.lt.s32.totalorder %s582_s15, 3 }
   0xa   : > { %p646_p6 = por %p112_p3, %p40_p0  ;;  %s584_s21 = smov [#allocation5]  }
   0xb   : > { %s789_s18 = scalar_select %p641_p4, 1, 0 }
   0xc   : > { %s790_s19 = scalar_select %p646_p6, 1, 0 }
   0xd   : > { %p651_p8 = pnand %p369_p5, %p119_p7  ;;  %s131_s22 = sshll.u32 %s584_s21, 4  ;;  %s132_s22 = int_to_ptr.vmem [resolvable:$true] %s131_s22 }
   0xe   : > { %s665_s24 = sadd.s32 1, %s582_s15   ;;  %s27_s25 = sadd.s32 1, %s578_s14 }
   0xf   : > { %s791_s20 = scalar_select %p651_p8, 1, 0 }
  0x10   : > { %p405_p9 = pneg %p651_p8  ;;  %s24_s26 = ssub.s32 %s582_s15, %s665_s24 }
  0x11   : > { %s471_s27 = scalar_lea.vmem %s132_s22, 256  ;;  %p479_p5 = scmp.lt.s32.totalorder %s132_s22, %s132_s22 }
  0x12   : > { %p660_p11 = pnand %p405_p9, %p785_p1  ;;  %p472_p13 = scmp.ne.s32.totalorder %s132_s22, %s471_s27 }
  0x13   : > { %p480_p7 = scmp.lt.s32.totalorder %s471_s27, %s471_s27 }
  0x14   : > { %p462_p12 = pneg %p660_p11 }
  0x15   : > { %p481_p10 = por %p480_p7, %p479_p5 }
  0x16   : > { %p474_p0 = pnand %p472_p13, %p462_p12 }
  0x18   : > { %p475_p3 = pneg %p474_p0 }
  0x1a   : > { %p482_p2 = pnand %p481_p10, %p475_p3 }
  0x1c   : > { %485 = shalt.err (!%p482_p2)
}
  0x1d   : > { %s585_s28 = smov 64   ;;  %s586_s29 = smov 4  }
  0x1e   : > { %408 = dma.hbm_to_vmem [thread:$0]  (!%p660_p11), %s782_s1, 256, %s132_s22, [#allocation6], %s585_s28, %s585_s28, %s586_s29  }
  0x1f   : > { %p25_p9 = scmp.eq.s32.totalorder %s24_s26, 0  ;;  %p34_p12 = scmp.ne.s32.totalorder %s578_s14, %s574_s13 }
  0x20   : > { %p35_p10 = scmp.eq.s32.totalorder %s582_s15, 0  ;;  %p418_p2 = scmp.lt.s32.totalorder %s582_s15, 2 }
  0x21   : > { %s682_s5 = scalar_select %p25_p9, %s578_s14, %s27_s25  }
  0x22   : > { %p36_p13 = por %p35_p10, %p34_p12  ;;  %p793_p0 = scmp.eq.s32.totalorder %s632_s16, 1 }
  0x23   : > { %s148_s7 = sand.u32 1, %s578_s14   ;;  %s373_s8 = sshll.u32 %s582_s15, 7 }
  0x24   : > { %p686_p3 = por %p793_p0, %p34_p12  ;;  %s372_s9 = sshll.u32 %s148_s7, 3 }
  0x25   : > { %s695_s17 = scalar_lea.hbm %s781_s0, %s373_s8  ;;  %s152_s21 = scalar_lea.vmem [#allocation2], %s372_s9 }
  0x26   : > { %s794_s6 = scalar_select %p686_p3, 1, 0 }
  0x27   : > { %s159_s22 = sshll.u32 %s152_s21, 4  ;;  %p697_p11 = pnand %p418_p2, %p36_p13  ;;  %s160_s22 = int_to_ptr.vmem [resolvable:$true] %s159_s22 }
  0x28   : > { %s149_s25 = scalar_lea.sflag [#allocation3], %s148_s7  ;;  %s486_s26 = scalar_lea.hbm %s695_s17, 128 }
  0x29   : > { %p487_p5 = scmp.ne.s32.totalorder %s695_s17, %s486_s26  ;;  %p488_p7 = pneg %p697_p11 }
  0x2a   : > { %s491_s29 = scalar_lea.hbm %s781_s0, 256  ;;  %p492_p10 = scmp.lt.s32.totalorder %s695_s17, %s781_s0 }
  0x2b   : > { %p489_p9 = pnand %p488_p7, %p487_p5  ;;  %p493_p2 = scmp.lt.s32.totalorder %s491_s29, %s486_s26 }
  0x2d   : > { %p490_p12 = pneg %p489_p9  ;;  %p494_p13 = por %p493_p2, %p492_p10 }
  0x2f   : > { %p495_p0 = pnand %p494_p13, %p490_p12 }
  0x31   : > { %498 = shalt.err (!%p495_p0)
}
  0x32   : > { %s499_s8 = scalar_lea.vmem %s160_s22, 128  ;;  %s587_s7 = smov [#allocation2]  }
  0x33   : > { %p500_p1 = scmp.ne.s32.totalorder %s160_s22, %s499_s8  ;;  %s504_s9 = sshll.u32 %s587_s7, 4  ;;  %s505_s9 = int_to_ptr.vmem [resolvable:$false] %s504_s9 }
  0x34   : > { %s506_s10 = scalar_lea.vmem %s505_s9, 256  ;;  %p507_p5 = scmp.lt.s32.totalorder %s160_s22, %s505_s9 }
  0x35   : > { %p502_p6 = pnand %p500_p1, %p488_p7  ;;  %p508_p9 = scmp.lt.s32.totalorder %s506_s10, %s499_s8 }
  0x37   : > { %p503_p3 = pneg %p502_p6  ;;  %p509_p4 = por %p508_p9, %p507_p5 }
  0x39   : > { %p510_p8 = pnand %p509_p4, %p503_p3 }
  0x3b   : > { %513 = shalt.err (!%p510_p8)
}
  0x3c   : > { %412 = dma.hbm_to_vmem [thread:$0]  (!%p697_p11), %s695_s17, 128, %s160_s22, %s149_s25  }
  0x3d   : > { %p796_p12 = scmp.ne.s32.totalorder %s791_s20, 0 }
  0x3e   : > { %s718_s11 = sand.u32 (!%p796_p12), 1, %s574_s13   ;;  %p797_p1 = scmp.ne.s32.totalorder (!%p796_p12), %s789_s18, 0 }
  0x3f   : > { %168 = sbr.rel (%p796_p12) target bundleno = 292 (0x124), region = 32  ;;  %s375_s21 = sshll.u32 (!%p796_p12), %s718_s11, 3 }
  0x40   : > { %s171_s26 = scalar_lea.sflag (!%p796_p12), [#allocation3], %s718_s11  ;;  %s174_s27 = scalar_lea.vmem (!%p796_p12), [#allocation2], %s375_s21 }
  0x44   : > { %557 = dma.done.wait (%p797_p1), %s171_s26, 128  }
  0x45   : > { %559 = vsyncadd (%p797_p1), %s171_s26, 4294967168  ;;  %p798_p4 = scmp.eq.s32.totalorder %s632_s16, 0 }
  0x47   : > { %561 = dma.done.wait (%p798_p4), [#allocation6], 256   ;;  %p799_p6 = pmov %p798_p4 }
  0x48   : > { %v588_v0 = vmov 0.0   ;;  %vm589_vm0 = vmmov 0   ;;  %v458_v1 = vld [vmem:[#allocation5 + $0x8] sm:$0xff]   ;;  %v459_v2 = vld [vmem:[#allocation5] sm:$0xff]   ;;  %v202_v3 = vld [vmem:[%s174_s27] sm:$0xff]  ;;  %vm227_vm1 = vcmask 261120  }
  0x49   : > { %563 = vsyncadd (%p799_p6), [#allocation6], 4294967040  ;;  %389 = vmatprep.subr.bf16.mxu0 %v588_v0  ;;  %393 = vmatprep.mubr.msk.bf16.mxu0 %vm589_vm0, %v588_v0  ;;  %v203_v4 = vpack.c.bf16 %v202_v3, %v202_v3  ;;  %s377_s18 = sshll.u32 %s718_s11, 2  ;;  %v378_v5 = vld [vmem:[%s783_s2] ss:$0 sm:$0xff]  ;;  %s383_s22 = sshll.u32 %s632_s16, 6 }
  0x4a   : > { %390 = vmatpush3.bf16.msra.mxu0 %v458_v1  ;;  %s200_s23 = scalar_lea.vmem [#allocation7], %s377_s18  ;;  %vm272_vm2 = vcmask 781312   ;;  %s738_s30 = scalar_lea.hbm %s784_s3, %s383_s22 }
  0x4b   : > { %391 = vmatprep.subr.bf16.mxu0 %v588_v0  ;;  %s288_s25 = sshll.u32 %s200_s23, 4  ;;  %s275_s16 = scalar_lea.sflag [#allocation4], %s718_s11  ;;  %s740_s25 = int_to_ptr.vmem [resolvable:$true] %s288_s25 }
  0x4c   : > { %s514_s4 = scalar_lea.vmem %s740_s25, 64  ;;  %p800_p3 = scmp.ne.s32.totalorder %s794_s6, 0 }
  0x4d   : > { %p515_p8 = scmp.ne.s32.totalorder %s740_s25, %s514_s4  ;;  %s590_s8 = smov [#allocation7]  }
  0x4e   : > { %392 = vmatpush3.bf16.msra.mxu0 %v459_v2  ;;  %s518_s7 = sshll.u32 %s590_s8, 4  ;;  %s519_s7 = int_to_ptr.vmem [resolvable:$false] %s518_s7 }
  0x4f   : > { %p516_p11 = pnand %p515_p8, %p800_p3  ;;  %s520_s9 = scalar_lea.vmem %s519_s7, 128 }
  0x50   : > { %p521_p10 = scmp.lt.s32.totalorder %s740_s25, %s519_s7  ;;  %p522_p2 = scmp.lt.s32.totalorder %s520_s9, %s514_s4 }
  0x51   : > { %394 = vmatmul.mubr.msk.bf16.vlgmr.msra.gmra.mxu0 %vm227_vm1, %v203_v4  ;;  %p517_p7 = pneg %p516_p11 }
  0x52   : > { %p523_p13 = por %p522_p2, %p521_p10 }
  0x54   : > { %p524_p0 = pnand %p523_p13, %p517_p7 }
 0x111   : > { %v265_v6 = vpop.f32.mrf.mxu0 }
 0x112   : > { %v266_v7 = vadd.f32 %v378_v5, %v265_v6 }
 0x113   : > { %v395_v8 = vpop.f32.mrf.mxu0 }
 0x114   : > { %v271_v9 = vpack.c.bf16 %v266_v7, %v266_v7 }
 0x115   : > { %v268_v10 = vpop.f32.mrf.mxu0 }
 0x116   : > { %273 = vst.msk [vmem:[%s200_s23] sm:$0xf] %vm272_vm2, %v271_v9 }
 0x117   : > { %v396_v11 = vpop.f32.mrf.mxu0 }
 0x118   : > { %527 = shalt.err (!%p524_p0)
}
 0x119   : > { %s528_s10 = scalar_lea.hbm %s738_s30, 64  ;;  %s532_s26 = scalar_lea.hbm %s784_s3, 128 }
 0x11a   : > { %p529_p5 = scmp.ne.s32.totalorder %s738_s30, %s528_s10  ;;  %p533_p1 = scmp.lt.s32.totalorder %s738_s30, %s784_s3 }
 0x11b   : > { %p534_p4 = scmp.lt.s32.totalorder %s532_s26, %s528_s10 }
 0x11c   : > { %p530_p9 = pnand %p529_p5, %p800_p3 }
 0x11d   : > { %p535_p6 = por %p534_p4, %p533_p1 }
 0x11e   : > { %p531_p12 = pneg %p530_p9 }
 0x120   : > { %p536_p8 = pnand %p535_p6, %p531_p12 }
 0x122   : > { %539 = shalt.err (!%p536_p8)
}
 0x123   : > { %403 = dma.vmem_to_hbm [thread:$0]  (%p800_p3), %s740_s25, 64, %s738_s30, %s275_s16  }
 0x124 PF: > { %s300_s20 = sand.u32 1, %s570_s12   ;;  %p801_p11 = scmp.ne.s32.totalorder %s790_s19, 0 }
 0x125   : > { %p802_p7 = scmp.ge.s32.totalorder %s582_s15, 2  ;;  %s301_s17 = scalar_lea.sflag [#allocation4], %s300_s20 }
 0x127   : > { %p414_p10 = pnand %p802_p7, %p801_p11 }
 0x129   : > { %p415_p2 = pneg %p414_p10 }
 0x12b   : > { %565 = dma.done.wait (%p415_p2), %s301_s17, 64  }
 0x12c   : > { %567 = vsyncadd (%p415_p2), %s301_s17, 4294967232  ;;  %p17_p13 = scmp.ge.s32.totalorder %s665_s24, 4   ;;  %s803_s12 = smov %s574_s13 }
 0x12d   : > { %s804_s13 = smov %s578_s14  ;;  %s805_s14 = smov %s682_s5 }
 0x12e   : > { %s806_s15 = smov %s665_s24  ;;  %19 = sbr.rel (!%p17_p13) target bundleno = 6 (0x6), region = 81 }
 0x133   :  { %306 = vsyncpa [#allocation3], 1 }
 0x134   :  { %308 = vsyncpa [#allocation3 + $0x1], 1 }
 0x135   :  { %309 = vsyncpa [#allocation6], 1 }
 0x136   :  { %310 = vsyncpa [#allocation4], 1 }
 0x137   :  { %312 = vsyncpa [#allocation4 + $0x1], 1 }

// kernel: tpu_custom_call.1
= control target key start
LH: loop header
LB: loop body
LE: loop exit
PB: predicated region body
PF: predicated region fallthrough
CT: control target
= control target key end

     0   :  { %8 = vsyncpa [#allocation3], 0  ;;  %s781_s0 = inlined_call_operand.hbm [shape: f32[2,8,32], index: 0, kind: input, shape index: {}]   ;;  %s782_s1 = inlined_call_operand.hbm [shape: bf16[32,96], index: 1, kind: input, shape index: {}]   ;;  %s783_s2 = inlined_call_operand.vmem [shape: f32[1,96], index: 2, kind: input, shape index: {}]   ;;  %s784_s3 = inlined_call_operand.hbm [shape: bf16[2,8,96], index: 3, kind: output, shape index: {}]  }
   0x1   :  { %10 = vsyncpa [#allocation3 + $0x1], 0 }
   0x2   :  { %11 = vsyncpa [#allocation6], 0 }
   0x3   :  { %12 = vsyncpa [#allocation4], 0 }
   0x4   :  { %14 = vsyncpa [#allocation4 + $0x1], 0  ;;  %s611_s12 = smov 0   ;;  %s613_s13 = smov 0  }
   0x5   :  { %s615_s14 = smov 0   ;;  %s617_s15 = smov 0  }
   0x6 LB: > { %s632_s16 = sadd.s32 4294967295, %s582_s15   ;;  %s368_s17 = sadd.s32 4294967294, %s582_s15   ;;  %s582_s15 = sphi %s617_s15, %s806_s15   ;;  %s578_s14 = sphi %s615_s14, %s805_s14   ;;  %s574_s13 = sphi %s613_s13, %s804_s13   ;;  %s570_s12 = sphi %s611_s12, %s803_s12  }
   0x7   : > { %p40_p0 = scmp.ne.s32.totalorder %s574_s13, %s570_s12  ;;  %p785_p1 = scmp.eq.s32.totalorder %s632_s16, 0 }
   0x8   : > { %p112_p3 = scmp.eq.s32.totalorder %s368_s17, 1  ;;  %p369_p5 = scmp.ge.s32.totalorder %s582_s15, 1 }
   0x9   : > { %p641_p4 = por %p785_p1, %p40_p0  ;;  %p119_p7 = scmp.lt.s32.totalorder %s582_s15, 3 }
   0xa   : > { %p646_p6 = por %p112_p3, %p40_p0  ;;  %s584_s21 = smov [#allocation5]  }
   0xb   : > { %s789_s18 = scalar_select %p641_p4, 1, 0 }
   0xc   : > { %s790_s19 = scalar_select %p646_p6, 1, 0 }
   0xd   : > { %p651_p8 = pnand %p369_p5, %p119_p7  ;;  %s131_s22 = sshll.u32 %s584_s21, 4  ;;  %s132_s22 = int_to_ptr.vmem [resolvable:$true] %s131_s22 }
   0xe   : > { %s665_s24 = sadd.s32 1, %s582_s15   ;;  %s27_s25 = sadd.s32 1, %s578_s14 }
   0xf   : > { %s791_s20 = scalar_select %p651_p8, 1, 0 }
  0x10   : > { %p405_p9 = pneg %p651_p8  ;;  %s24_s26 = ssub.s32 %s582_s15, %s665_s24 }
  0x11   : > { %s471_s27 = scalar_lea.vmem %s132_s22, 256  ;;  %p479_p5 = scmp.lt.s32.totalorder %s132_s22, %s132_s22 }
  0x12   : > { %p660_p11 = pnand %p405_p9, %p785_p1  ;;  %p472_p13 = scmp.ne.s32.totalorder %s132_s22, %s471_s27 }
  0x13   : > { %p480_p7 = scmp.lt.s32.totalorder %s471_s27, %s471_s27 }
  0x14   : > { %p462_p12 = pneg %p660_p11 }
  0x15   : > { %p481_p10 = por %p480_p7, %p479_p5 }
  0x16   : > { %p474_p0 = pnand %p472_p13, %p462_p12 }
  0x18   : > { %p475_p3 = pneg %p474_p0 }
  0x1a   : > { %p482_p2 = pnand %p481_p10, %p475_p3 }
  0x1c   : > { %485 = shalt.err (!%p482_p2)
}
  0x1d   : > { %s585_s28 = smov 64   ;;  %s586_s29 = smov 4  }
  0x1e   : > { %408 = dma.hbm_to_vmem [thread:$0]  (!%p660_p11), %s782_s1, 256, %s132_s22, [#allocation6], %s585_s28, %s585_s28, %s586_s29  }
  0x1f   : > { %p25_p9 = scmp.eq.s32.totalorder %s24_s26, 0  ;;  %p34_p12 = scmp.ne.s32.totalorder %s578_s14, %s574_s13 }
  0x20   : > { %p35_p10 = scmp.eq.s32.totalorder %s582_s15, 0  ;;  %p418_p2 = scmp.lt.s32.totalorder %s582_s15, 2 }
  0x21   : > { %s682_s5 = scalar_select %p25_p9, %s578_s14, %s27_s25  }
  0x22   : > { %p36_p13 = por %p35_p10, %p34_p12  ;;  %p793_p0 = scmp.eq.s32.totalorder %s632_s16, 1 }
  0x23   : > { %s148_s7 = sand.u32 1, %s578_s14   ;;  %s373_s8 = sshll.u32 %s582_s15, 7 }
  0x24   : > { %p686_p3 = por %p793_p0, %p34_p12  ;;  %s372_s9 = sshll.u32 %s148_s7, 3 }
  0x25   : > { %s695_s17 = scalar_lea.hbm %s781_s0, %s373_s8  ;;  %s152_s21 = scalar_lea.vmem [#allocation2], %s372_s9 }
  0x26   : > { %s794_s6 = scalar_select %p686_p3, 1, 0 }
  0x27   : > { %s159_s22 = sshll.u32 %s152_s21, 4  ;;  %p697_p11 = pnand %p418_p2, %p36_p13  ;;  %s160_s22 = int_to_ptr.vmem [resolvable:$true] %s159_s22 }
  0x28   : > { %s149_s25 = scalar_lea.sflag [#allocation3], %s148_s7  ;;  %s486_s26 = scalar_lea.hbm %s695_s17, 128 }
  0x29   : > { %p487_p5 = scmp.ne.s32.totalorder %s695_s17, %s486_s26  ;;  %p488_p7 = pneg %p697_p11 }
  0x2a   : > { %s491_s29 = scalar_lea.hbm %s781_s0, 256  ;;  %p492_p10 = scmp.lt.s32.totalorder %s695_s17, %s781_s0 }
  0x2b   : > { %p489_p9 = pnand %p488_p7, %p487_p5  ;;  %p493_p2 = scmp.lt.s32.totalorder %s491_s29, %s486_s26 }
  0x2d   : > { %p490_p12 = pneg %p489_p9  ;;  %p494_p13 = por %p493_p2, %p492_p10 }
  0x2f   : > { %p495_p0 = pnand %p494_p13, %p490_p12 }
  0x31   : > { %498 = shalt.err (!%p495_p0)
}
  0x32   : > { %s499_s8 = scalar_lea.vmem %s160_s22, 128  ;;  %s587_s7 = smov [#allocation2]  }
  0x33   : > { %p500_p1 = scmp.ne.s32.totalorder %s160_s22, %s499_s8  ;;  %s504_s9 = sshll.u32 %s587_s7, 4  ;;  %s505_s9 = int_to_ptr.vmem [resolvable:$false] %s504_s9 }
  0x34   : > { %s506_s10 = scalar_lea.vmem %s505_s9, 256  ;;  %p507_p5 = scmp.lt.s32.totalorder %s160_s22, %s505_s9 }
  0x35   : > { %p502_p6 = pnand %p500_p1, %p488_p7  ;;  %p508_p9 = scmp.lt.s32.totalorder %s506_s10, %s499_s8 }
  0x37   : > { %p503_p3 = pneg %p502_p6  ;;  %p509_p4 = por %p508_p9, %p507_p5 }
  0x39   : > { %p510_p8 = pnand %p509_p4, %p503_p3 }
  0x3b   : > { %513 = shalt.err (!%p510_p8)
}
  0x3c   : > { %412 = dma.hbm_to_vmem [thread:$0]  (!%p697_p11), %s695_s17, 128, %s160_s22, %s149_s25  }
  0x3d   : > { %p796_p12 = scmp.ne.s32.totalorder %s791_s20, 0 }
  0x3e   : > { %s718_s11 = sand.u32 (!%p796_p12), 1, %s574_s13   ;;  %p797_p1 = scmp.ne.s32.totalorder (!%p796_p12), %s789_s18, 0 }
  0x3f   : > { %168 = sbr.rel (%p796_p12) target bundleno = 292 (0x124), region = 32  ;;  %s375_s21 = sshll.u32 (!%p796_p12), %s718_s11, 3 }
  0x40   : > { %s171_s26 = scalar_lea.sflag (!%p796_p12), [#allocation3], %s718_s11  ;;  %s174_s27 = scalar_lea.vmem (!%p796_p12), [#allocation2], %s375_s21 }
  0x44   : > { %557 = dma.done.wait (%p797_p1), %s171_s26, 128  }
  0x45   : > { %559 = vsyncadd (%p797_p1), %s171_s26, 4294967168  ;;  %p798_p4 = scmp.eq.s32.totalorder %s632_s16, 0 }
  0x47   : > { %561 = dma.done.wait (%p798_p4), [#allocation6], 256   ;;  %p799_p6 = pmov %p798_p4 }
  0x48   : > { %v588_v0 = vmov 0.0   ;;  %vm589_vm0 = vmmov 0   ;;  %v458_v1 = vld [vmem:[#allocation5 + $0x8] sm:$0xff]   ;;  %v459_v2 = vld [vmem:[#allocation5] sm:$0xff]   ;;  %v202_v3 = vld [vmem:[%s174_s27] sm:$0xff]  ;;  %vm227_vm1 = vcmask 261120  }
  0x49   : > { %563 = vsyncadd (%p799_p6), [#allocation6], 4294967040  ;;  %389 = vmatprep.subr.bf16.mxu0 %v588_v0  ;;  %393 = vmatprep.mubr.msk.bf16.mxu0 %vm589_vm0, %v588_v0  ;;  %v203_v4 = vpack.c.bf16 %v202_v3, %v202_v3  ;;  %s377_s18 = sshll.u32 %s718_s11, 2  ;;  %v378_v5 = vld [vmem:[%s783_s2] ss:$0 sm:$0xff]  ;;  %s383_s22 = sshll.u32 %s632_s16, 6 }
  0x4a   : > { %390 = vmatpush3.bf16.msra.mxu0 %v458_v1  ;;  %s200_s23 = scalar_lea.vmem [#allocation7], %s377_s18  ;;  %vm272_vm2 = vcmask 781312   ;;  %s738_s30 = scalar_lea.hbm %s784_s3, %s383_s22 }
  0x4b   : > { %391 = vmatprep.subr.bf16.mxu0 %v588_v0  ;;  %s288_s25 = sshll.u32 %s200_s23, 4  ;;  %s275_s16 = scalar_lea.sflag [#allocation4], %s718_s11  ;;  %s740_s25 = int_to_ptr.vmem [resolvable:$true] %s288_s25 }
  0x4c   : > { %s514_s4 = scalar_lea.vmem %s740_s25, 64  ;;  %p800_p3 = scmp.ne.s32.totalorder %s794_s6, 0 }
  0x4d   : > { %p515_p8 = scmp.ne.s32.totalorder %s740_s25, %s514_s4  ;;  %s590_s8 = smov [#allocation7]  }
  0x4e   : > { %392 = vmatpush3.bf16.msra.mxu0 %v459_v2  ;;  %s518_s7 = sshll.u32 %s590_s8, 4  ;;  %s519_s7 = int_to_ptr.vmem [resolvable:$false] %s518_s7 }
  0x4f   : > { %p516_p11 = pnand %p515_p8, %p800_p3  ;;  %s520_s9 = scalar_lea.vmem %s519_s7, 128 }
  0x50   : > { %p521_p10 = scmp.lt.s32.totalorder %s740_s25, %s519_s7  ;;  %p522_p2 = scmp.lt.s32.totalorder %s520_s9, %s514_s4 }
  0x51   : > { %394 = vmatmul.mubr.msk.bf16.vlgmr.msra.gmra.mxu0 %vm227_vm1, %v203_v4  ;;  %p517_p7 = pneg %p516_p11 }
  0x52   : > { %p523_p13 = por %p522_p2, %p521_p10 }
  0x54   : > { %p524_p0 = pnand %p523_p13, %p517_p7 }
 0x111   : > { %v265_v6 = vpop.f32.mrf.mxu0 }
 0x112   : > { %v266_v7 = vadd.f32 %v378_v5, %v265_v6 }
 0x113   : > { %v395_v8 = vpop.f32.mrf.mxu0 }
 0x114   : > { %v271_v9 = vpack.c.bf16 %v266_v7, %v266_v7 }
 0x115   : > { %v268_v10 = vpop.f32.mrf.mxu0 }
 0x116   : > { %273 = vst.msk [vmem:[%s200_s23] sm:$0xf] %vm272_vm2, %v271_v9 }
 0x117   : > { %v396_v11 = vpop.f32.mrf.mxu0 }
 0x118   : > { %527 = shalt.err (!%p524_p0)
}
 0x119   : > { %s528_s10 = scalar_lea.hbm %s738_s30, 64  ;;  %s532_s26 = scalar_lea.hbm %s784_s3, 128 }
 0x11a   : > { %p529_p5 = scmp.ne.s32.totalorder %s738_s30, %s528_s10  ;;  %p533_p1 = scmp.lt.s32.totalorder %s738_s30, %s784_s3 }
 0x11b   : > { %p534_p4 = scmp.lt.s32.totalorder %s532_s26, %s528_s10 }
 0x11c   : > { %p530_p9 = pnand %p529_p5, %p800_p3 }
 0x11d   : > { %p535_p6 = por %p534_p4, %p533_p1 }
 0x11e   : > { %p531_p12 = pneg %p530_p9 }
 0x120   : > { %p536_p8 = pnand %p535_p6, %p531_p12 }
 0x122   : > { %539 = shalt.err (!%p536_p8)
}
 0x123   : > { %403 = dma.vmem_to_hbm [thread:$0]  (%p800_p3), %s740_s25, 64, %s738_s30, %s275_s16  }
 0x124 PF: > { %s300_s20 = sand.u32 1, %s570_s12   ;;  %p801_p11 = scmp.ne.s32.totalorder %s790_s19, 0 }
 0x125   : > { %p802_p7 = scmp.ge.s32.totalorder %s582_s15, 2  ;;  %s301_s17 = scalar_lea.sflag [#allocation4], %s300_s20 }
 0x127   : > { %p414_p10 = pnand %p802_p7, %p801_p11 }
 0x129   : > { %p415_p2 = pneg %p414_p10 }
 0x12b   : > { %565 = dma.done.wait (%p415_p2), %s301_s17, 64  }
 0x12c   : > { %567 = vsyncadd (%p415_p2), %s301_s17, 4294967232  ;;  %p17_p13 = scmp.ge.s32.totalorder %s665_s24, 4   ;;  %s803_s12 = smov %s574_s13 }
 0x12d   : > { %s804_s13 = smov %s578_s14  ;;  %s805_s14 = smov %s682_s5 }
 0x12e   : > { %s806_s15 = smov %s665_s24  ;;  %19 = sbr.rel (!%p17_p13) target bundleno = 6 (0x6), region = 81 }
 0x133   :  { %306 = vsyncpa [#allocation3], 1 }
 0x134   :  { %308 = vsyncpa [#allocation3 + $0x1], 1 }
 0x135   :  { %309 = vsyncpa [#allocation6], 1 }
 0x136   :  { %310 = vsyncpa [#allocation4], 1 }
 0x137   :  { %312 = vsyncpa [#allocation4 + $0x1], 1 }

</bundles_post_ra>
